<compile_context>
chip_gen: v5e
topology: v5e:2x2
jax: 0.10.0
libtpu: 0.0.40
codegen_flags: <defaults>
</compile_context>

<pallas_src>
import functools
import numpy as np
import jax
import jax.numpy as jnp
from jax.experimental import pallas as pl
from jax.experimental.pallas import tpu as pltpu


TM_MAX = 256          # rows (N*OH*OW) per tile
TN_MAX = 2048         # output channels per tile (wide so gn == 1 everywhere)
TK_MAX = 2048         # reduction per tile
_BN_EPS = 1e-5
_BN_SCALE = float(1.0 / np.sqrt(1.0 + _BN_EPS))   # eval BN, default stats
_VMEM_LIMIT = 48 * 1024 * 1024                    # <= v7x physical 64 MiB


def _ru(x, m):
    return -(-x // m) * m


def _split_tiled(dim_padded, tmax, align):
    """(tile, num) with tile*num == dim_padded, tile % align == 0, tile<=~tmax."""
    q = dim_padded // align
    g = max(1, -(-dim_padded // tmax))
    while q % g:
        g += 1
    return dim_padded // g, g


# ----------------------------------------------------------------------------
# Tiled GEMM kernel with fused (bias, BN-scale, residual, ReLU) epilogue
# ----------------------------------------------------------------------------
@functools.lru_cache(maxsize=None)
def _build_matmul(Mp, Kp, Np, TM, TN, TK, scale, relu, has_residual):
    gm, gn, gk = Mp // TM, Np // TN, Kp // TK

    def epilogue(acc, bias, res):
        out = acc * scale + bias
        if res is not None:
            out = out + res.astype(jnp.float32)
        if relu:
            out = jnp.maximum(out, 0.0)
        return out.astype(jnp.bfloat16)

    if gk == 1:
        # Whole reduction fits one K tile: no accumulator scratch needed.
        if has_residual:
            def kernel(a_ref, b_ref, bias_ref, r_ref, o_ref):
                acc = jnp.dot(a_ref[...], b_ref[...],
                              preferred_element_type=jnp.float32)
                o_ref[...] = epilogue(acc, bias_ref[...], r_ref[...])
        else:
            def kernel(a_ref, b_ref, bias_ref, o_ref):
                acc = jnp.dot(a_ref[...], b_ref[...],
                              preferred_element_type=jnp.float32)
                o_ref[...] = epilogue(acc, bias_ref[...], None)

        grid = (gm, gn)
        in_specs = [pl.BlockSpec((TM, TK), lambda i, j: (i, 0)),
                    pl.BlockSpec((TK, TN), lambda i, j: (0, j)),
                    pl.BlockSpec((1, TN), lambda i, j: (0, j))]
        if has_residual:
            in_specs.append(pl.BlockSpec((TM, TN), lambda i, j: (i, j)))
        out_specs = pl.BlockSpec((TM, TN), lambda i, j: (i, j))
        scratch = ()
        dims = ("parallel", "parallel")
    else:
        if has_residual:
            def kernel(a_ref, b_ref, bias_ref, r_ref, o_ref, acc_ref):
                @pl.when(pl.program_id(2) == 0)
                def _():
                    acc_ref[...] = jnp.zeros_like(acc_ref)
                acc_ref[...] += jnp.dot(a_ref[...], b_ref[...],
                                        preferred_element_type=jnp.float32)

                @pl.when(pl.program_id(2) == pl.num_programs(2) - 1)
                def _():
                    o_ref[...] = epilogue(acc_ref[...], bias_ref[...], r_ref[...])
        else:
            def kernel(a_ref, b_ref, bias_ref, o_ref, acc_ref):
                @pl.when(pl.program_id(2) == 0)
                def _():
                    acc_ref[...] = jnp.zeros_like(acc_ref)
                acc_ref[...] += jnp.dot(a_ref[...], b_ref[...],
                                        preferred_element_type=jnp.float32)

                @pl.when(pl.program_id(2) == pl.num_programs(2) - 1)
                def _():
                    o_ref[...] = epilogue(acc_ref[...], bias_ref[...], None)

        grid = (gm, gn, gk)
        in_specs = [pl.BlockSpec((TM, TK), lambda i, j, k: (i, k)),
                    pl.BlockSpec((TK, TN), lambda i, j, k: (k, j)),
                    pl.BlockSpec((1, TN), lambda i, j, k: (0, j))]
        if has_residual:
            in_specs.append(pl.BlockSpec((TM, TN), lambda i, j, k: (i, j)))
        out_specs = pl.BlockSpec((TM, TN), lambda i, j, k: (i, j))
        scratch = (pltpu.VMEM((TM, TN), jnp.float32),)
        dims = ("parallel", "parallel", "arbitrary")

    cost = pl.CostEstimate(
        flops=2 * Mp * Np * Kp,
        transcendentals=0,
        bytes_accessed=(Mp * Kp + Kp * Np + Mp * Np) * 2)

    call = pl.pallas_call(
        kernel,
        out_shape=jax.ShapeDtypeStruct((Mp, Np), jnp.bfloat16),
        grid_spec=pltpu.PrefetchScalarGridSpec(
            num_scalar_prefetch=0,
            grid=grid,
            in_specs=in_specs,
            out_specs=out_specs,
            scratch_shapes=scratch),
        compiler_params=pltpu.CompilerParams(
            dimension_semantics=dims,
            vmem_limit_bytes=_VMEM_LIMIT),
        cost_estimate=cost)
    return jax.jit(call)


def _conv_gemm(a, w2, bias, scale, relu, residual=None):
    """a: (M, K) bf16; w2: (Kp, Np) bf16 (pre-padded); residual: (M, Np) bf16."""
    M, K = a.shape
    Kp, Np = w2.shape
    TK, _ = _split_tiled(Kp, TK_MAX, 128)
    TN, gn = _split_tiled(Np, TN_MAX, 128)

    Mp8 = _ru(max(M, 8), 8)
    TM, gm = _split_tiled(Mp8, TM_MAX, 8)
    if gm == 1 and gn == 1 and TM >= 16:
        TM = _ru(-(-Mp8 // 2), 8)          # give both v7x cores a row tile
        gm = 2
    Mp = TM * gm

    if Kp != K or Mp != M:
        a = jnp.pad(a, ((0, Mp - M), (0, Kp - K)))
    if residual is not None and Mp != M:
        residual = jnp.pad(residual, ((0, Mp - M), (0, 0)))

    if bias is None:
        bias_arr = jnp.zeros((1, Np), jnp.float32)
    else:
        bias_arr = jnp.zeros((1, Np), jnp.float32).at[0, :bias.shape[0]].set(
            bias.astype(jnp.float32))

    fn = _build_matmul(Mp, Kp, Np, TM, TN, TK, float(scale), bool(relu),
                       residual is not None)
    args = (a, w2, bias_arr) + ((residual,) if residual is not None else ())
    out = fn(*args)
    if Mp != M:
        out = out[:M]
    return out


# ----------------------------------------------------------------------------
# Dedicated dilated 3x3 "same" conv kernel (ASPP): no im2col materialization.
# Grid (n, h_block, tap_row); the H tap shift is a block-aligned index_map
# offset (TH | dilation), the three W tap shifts are static slices of the
# VMEM-resident block.  Accumulation over tap rows in a VMEM scratch.
# ----------------------------------------------------------------------------
def _pick_th(d, H, max_th=16):
    divs = [t for t in range(min(d, max_th), 0, -1) if d % t == 0]
    for t in divs:
        if H % t == 0:
            return t
    return divs[0]


@functools.lru_cache(maxsize=None)
def _build_dilated_conv(N, H, W, Cp, OCp, kh, kw, d, TH, scale, relu):
    Hpad = _ru(H, TH)
    Hp, Wp = Hpad + 2 * d, W + 2 * d
    gh = Hpad // TH
    MT = TH * W
    shift = d // TH

    def kernel(x_ref, w_ref, bias_ref, o_ref, acc_ref):
        ih = pl.program_id(2)

        @pl.when(ih == 0)
        def _():
            acc_ref[...] = jnp.zeros_like(acc_ref)

        for iw in range(kw):                       # static unroll over W taps
            win = x_ref[0, :, pl.ds(iw * d, W), :]         # (TH, W, Cp)
            acc_ref[...] += jnp.dot(win.reshape(MT, Cp),
                                    w_ref[ih * kw + iw],
                                    preferred_element_type=jnp.float32)

        @pl.when(ih == kh - 1)
        def _():
            out = acc_ref[...] * scale + bias_ref[...]
            if relu:
                out = jnp.maximum(out, 0.0)
            o_ref[0] = out.reshape(TH, W, OCp).astype(jnp.bfloat16)

    call = pl.pallas_call(
        kernel,
        out_shape=jax.ShapeDtypeStruct((N, Hpad, W, OCp), jnp.bfloat16),
        grid_spec=pltpu.PrefetchScalarGridSpec(
            num_scalar_prefetch=0,
            grid=(N, gh, kh),
            in_specs=[
                pl.BlockSpec((1, TH, Wp, Cp),
                             lambda n, hb, ih: (n, hb + ih * shift, 0, 0)),
                pl.BlockSpec((kh * kw, Cp, OCp),
                             lambda n, hb, ih: (0, 0, 0)),
                pl.BlockSpec((1, OCp), lambda n, hb, ih: (0, 0)),
            ],
            out_specs=pl.BlockSpec((1, TH, W, OCp),
                                   lambda n, hb, ih: (n, hb, 0, 0)),
            scratch_shapes=(pltpu.VMEM((MT, OCp), jnp.float32),)),
        compiler_params=pltpu.CompilerParams(
            dimension_semantics=("parallel", "parallel", "arbitrary"),
            vmem_limit_bytes=_VMEM_LIMIT),
        cost_estimate=pl.CostEstimate(
            flops=2 * N * Hpad * W * kh * kw * Cp * OCp,
            transcendentals=0,
            bytes_accessed=(N * Hp * Wp * Cp * kh + kh * kw * Cp * OCp
                            + N * Hpad * W * OCp) * 2))
    return jax.jit(call)


def _dilated_conv(x, cw, d, scale, relu):
    N, H, W, Cp = x.shape
    kh, kw, ocp = cw['kh'], cw['kw'], cw['ocp']
    TH = _pick_th(d, H)
    Hpad = _ru(H, TH)
    xp = jnp.pad(x, ((0, 0), (d, d + Hpad - H), (d, d), (0, 0)))
    bias_arr = jnp.zeros((1, ocp), jnp.float32)
    fn = _build_dilated_conv(N, H, W, Cp, ocp, kh, kw, d, TH,
                             float(scale), bool(relu))
    out = fn(xp, cw['w4'], bias_arr)
    if Hpad != H:
        out = out[:, :H]
    return out


# ----------------------------------------------------------------------------
# Conv / pooling glue (PyTorch-equivalent semantics, NHWC bf16, padded C)
# ----------------------------------------------------------------------------
def conv2d(x, cw, stride=1, padding=0, dilation=1, bias=None,
           scale=1.0, relu=False, residual=None):
    N, H, W, Cp = x.shape
    kh, kw, ocp = cw['kh'], cw['kw'], cw['ocp']
    s, p, d = stride, padding, dilation
    assert Cp == cw['icp'], (Cp, cw['icp'])
    OH = (H + 2 * p - d * (kh - 1) - 1) // s + 1
    OW = (W + 2 * p - d * (kw - 1) - 1) // s + 1

    use_dilated = (residual is None and s == 1 and kh == 3 and kw == 3
                   and p == d and d >= 8 and Cp % 128 == 0 and W % 8 == 0
                   and 'w4' in cw)
    if use_dilated:
        return _dilated_conv(x, cw, d, scale, relu)

    if kh == 1 and kw == 1 and p == 0:
        xs = x[:, ::s, ::s, :] if s != 1 else x
        a = xs.reshape(N * OH * OW, Cp)
    else:
        xp = jnp.pad(x, ((0, 0), (p, p), (p, p), (0, 0)))
        cols = []
        for ih in range(kh):
            for iw in range(kw):
                cols.append(jax.lax.slice(
                    xp,
                    (0, ih * d, iw * d, 0),
                    (N, ih * d + (OH - 1) * s + 1,
                     iw * d + (OW - 1) * s + 1, Cp),
                    (1, s, s, 1)))
        a = jnp.concatenate(cols, axis=-1).reshape(N * OH * OW, kh * kw * Cp)

    res_flat = None
    if residual is not None:
        res_flat = residual.reshape(N * OH * OW, ocp)

    out = _conv_gemm(a, cw['w2'], bias, scale, relu, residual=res_flat)
    return out.reshape(N, OH, OW, ocp)


def maxpool2d(x, k=3, s=2, p=1):
    neg = jnp.array(-jnp.inf, x.dtype)
    return jax.lax.reduce_window(
        x, neg, jax.lax.max,
        (1, k, k, 1), (1, s, s, 1),
        [(0, 0), (p, p), (p, p), (0, 0)])


# ----------------------------------------------------------------------------
# Deterministic parameter construction (DeepLabV3-ResNet50, num_classes=1)
# ----------------------------------------------------------------------------
class KeyGen:
    def __init__(self, key):
        self._key = key

    def __call__(self):
        self._key, sub = jax.random.split(self._key)
        return sub


def _he_conv(kg, oc, ic, kh, kw, keep4d=False):
    fan_in = ic * kh * kw
    w = jax.random.normal(kg(), (oc, ic, kh, kw), jnp.float32) * np.sqrt(2.0 / fan_in)
    icp = ic if ic < 8 else _ru(ic, 128)     # channel-padded input (persisted layout)
    ocp = _ru(oc, 128)
    w4 = jnp.transpose(w, (2, 3, 1, 0))                      # (kh, kw, ic, oc)
    w4 = jnp.pad(w4, ((0, 0), (0, 0), (0, icp - ic), (0, ocp - oc)))
    w4 = w4.astype(jnp.bfloat16)
    K = kh * kw * icp
    Kp = _ru(K, 128)
    w2 = w4.reshape(K, ocp)
    if Kp != K:
        w2 = jnp.pad(w2, ((0, Kp - K), (0, 0)))
    cw = {'w2': w2, 'kh': kh, 'kw': kw, 'ic': ic, 'icp': icp,
          'oc': oc, 'ocp': ocp}
    if keep4d:
        cw['w4'] = w4.reshape(kh * kw, icp, ocp)
    return cw


def build_params(key):
    kg = KeyGen(key)
    P = {}
    P['conv1'] = _he_conv(kg, 64, 3, 7, 7)

    # (planes, num_blocks, stride, dilation_first_block, dilation_rest)
    # replace_stride_with_dilation = [False, True, True]  (output stride 8)
    layer_cfg = [
        (64, 3, 1, 1, 1),
        (128, 4, 2, 1, 1),
        (256, 6, 1, 1, 2),
        (512, 3, 1, 2, 4),
    ]
    inplanes = 64
    P['layers'] = []
    for planes, nblocks, stride, dil_first, dil_rest in layer_cfg:
        blocks = []
        for b in range(nblocks):
            s = stride if b == 0 else 1
            dil = dil_first if b == 0 else dil_rest
            blk = {
                'stride': s,
                'dilation': dil,
                'conv1': _he_conv(kg, planes, inplanes, 1, 1),
                'conv2': _he_conv(kg, planes, planes, 3, 3),
                'conv3': _he_conv(kg, planes * 4, planes, 1, 1),
            }
            if b == 0 and (s != 1 or inplanes != planes * 4):
                blk['downsample'] = _he_conv(kg, planes * 4, inplanes, 1, 1)
            blocks.append(blk)
            inplanes = planes * 4
        P['layers'].append(blocks)

    # DeepLabHead: ASPP(2048, [12, 24, 36]) + 3x3 conv + 1x1 classifier
    P['aspp0'] = _he_conv(kg, 256, 2048, 1, 1)
    P['aspp1'] = _he_conv(kg, 256, 2048, 3, 3, keep4d=True)   # dilation 12
    P['aspp2'] = _he_conv(kg, 256, 2048, 3, 3, keep4d=True)   # dilation 24
    P['aspp3'] = _he_conv(kg, 256, 2048, 3, 3, keep4d=True)   # dilation 36
    P['aspp_pool'] = _he_conv(kg, 256, 2048, 1, 1)
    P['aspp_project'] = _he_conv(kg, 256, 5 * 256, 1, 1)
    P['head_conv'] = _he_conv(kg, 256, 256, 3, 3)
    P['cls'] = _he_conv(kg, 1, 256, 1, 1)
    P['cls_b'] = jnp.zeros((1,), jnp.float32)
    return P


# ----------------------------------------------------------------------------
# Forward pass (== FirstModel.forward, eval-mode semantics)
# ----------------------------------------------------------------------------
_MEAN = jnp.array([0.485, 0.456, 0.406], jnp.float32).reshape(1, 3, 1, 1)
_STD = jnp.array([0.229, 0.224, 0.225], jnp.float32).reshape(1, 3, 1, 1)


def bottleneck(x, blk):
    s, d = blk['stride'], blk['dilation']
    identity = x
    out = conv2d(x, blk['conv1'], scale=_BN_SCALE, relu=True)
    out = conv2d(out, blk['conv2'], stride=s, padding=d, dilation=d,
                 scale=_BN_SCALE, relu=True)
    if 'downsample' in blk:
        identity = conv2d(x, blk['downsample'], stride=s,
                          scale=_BN_SCALE, relu=False)
    # conv3 + BN + residual add + ReLU fused in one GEMM epilogue
    return conv2d(out, blk['conv3'], scale=_BN_SCALE, relu=True,
                  residual=identity)


def first_model_forward(params, image):
    N, _, H, W = image.shape
    x = (image - _MEAN) / _STD                      # register_buffer mean/std
    x = jnp.transpose(x, (0, 2, 3, 1)).astype(jnp.bfloat16)   # NHWC bf16

    # ResNet50 backbone (output stride 8)
    x = conv2d(x, params['conv1'], stride=2, padding=3,
               scale=_BN_SCALE, relu=True)
    x = maxpool2d(x)
    for blocks in params['layers']:
        for blk in blocks:
            x = bottleneck(x, blk)

    # DeepLabHead: ASPP
    hf, wf = x.shape[1], x.shape[2]
    branches = [conv2d(x, params['aspp0'], scale=_BN_SCALE, relu=True)]
    for name, rate in (('aspp1', 12), ('aspp2', 24), ('aspp3', 36)):
        branches.append(conv2d(x, params[name], padding=rate, dilation=rate,
                               scale=_BN_SCALE, relu=True))
    pooled = jnp.mean(x.astype(jnp.float32), axis=(1, 2), keepdims=True)
    pooled = conv2d(pooled.astype(jnp.bfloat16), params['aspp_pool'],
                    scale=_BN_SCALE, relu=True)
    pooled = jax.image.resize(pooled.astype(jnp.float32),
                              (N, hf, wf, pooled.shape[-1]),
                              method='bilinear').astype(jnp.bfloat16)
    branches.append(pooled)

    y = jnp.concatenate(branches, axis=-1)                   # (N, hf, wf, 1280)
    y = conv2d(y, params['aspp_project'], scale=_BN_SCALE, relu=True)
    # Dropout(0.5): identity in eval mode.
    y = conv2d(y, params['head_conv'], padding=1, scale=_BN_SCALE, relu=True)
    y = conv2d(y, params['cls'], bias=params['cls_b'])
    y = y[..., :1]                                           # drop padded channels

    # F.interpolate(..., size=input, mode='bilinear', align_corners=False)
    out = jax.image.resize(y.astype(jnp.float32), (N, H, W, 1),
                           method='bilinear')
    return jnp.transpose(out, (0, 3, 1, 2))                  # back to NCHW


if __name__ == "__main__":
    key = jax.random.PRNGKey(0)
    pkey, xkey = jax.random.split(key)
    params = build_params(pkey)
    image = jax.random.uniform(xkey, (2, 3, 64, 64), jnp.float32)

    out = first_model_forward(params, image)
    out = jax.block_until_ready(out)

    assert out.shape == (2, 1, 64, 64), out.shape
    assert bool(jnp.all(jnp.isfinite(out)))
    print("KERNEL_OK")
</pallas_src>

<mosaic_0001>
module attributes {stable_mosaic.version = 11 : i64} {
  func.func @kernel(%arg0: i32, %arg1: i32, %arg2: memref<256x256xbf16, #tpu.memory_space<vmem>>, %arg3: memref<256x128xbf16, #tpu.memory_space<vmem>>, %arg4: memref<1x128xf32, #tpu.memory_space<vmem>>, %arg5: memref<256x128xbf16, #tpu.memory_space<vmem>>) attributes {dimension_semantics = [#tpu.dimension_semantics<parallel>, #tpu.dimension_semantics<parallel>], iteration_bounds = array<i64: 8, 1>, scalar_prefetch = 0 : i64, scratch_operands = 0 : i64, tpu.core_type = #tpu.core_type<tc>, window_params = [{transform_indices = @transform_0, window_bounds = array<i64: 256, 256>}, {transform_indices = @transform_1, window_bounds = array<i64: 256, 128>}, {transform_indices = @transform_2, window_bounds = array<i64: 1, 128>}, {transform_indices = @transform_3, window_bounds = array<i64: 256, 128>}]} {
    %c0 = arith.constant 0 : index
    %c0_0 = arith.constant 0 : index
    %0 = vector.load %arg2[%c0, %c0_0] : memref<256x256xbf16, #tpu.memory_space<vmem>>, vector<256x256xbf16>
    %c0_1 = arith.constant 0 : index
    %c0_2 = arith.constant 0 : index
    %1 = vector.load %arg3[%c0_1, %c0_2] : memref<256x128xbf16, #tpu.memory_space<vmem>>, vector<256x128xbf16>
    %cst = arith.constant dense<0.000000e+00> : vector<256x128xf32>
    %2 = tpu.matmul %0, %1, %cst {dimension_numbers = #tpu.dot_dimension_numbers<[1], [0], [0], [1], [0, 0, 1, 1], [], []>} : vector<256x256xbf16>, vector<256x128xbf16>, vector<256x128xf32> -> vector<256x128xf32>
    %c0_3 = arith.constant 0 : index
    %c0_4 = arith.constant 0 : index
    %3 = vector.load %arg4[%c0_3, %c0_4] : memref<1x128xf32, #tpu.memory_space<vmem>>, vector<1x128xf32>
    %cst_5 = arith.constant 0.999994993 : f32
    %4 = vector.broadcast %cst_5 : f32 to vector<256x128xf32>
    %5 = arith.mulf %2, %4 : vector<256x128xf32>
    %6 = vector.broadcast %3 : vector<1x128xf32> to vector<256x128xf32>
    %7 = arith.addf %5, %6 : vector<256x128xf32>
    %cst_6 = arith.constant 0.000000e+00 : f32
    %8 = vector.broadcast %cst_6 : f32 to vector<256x128xf32>
    %9 = arith.maximumf %7, %8 : vector<256x128xf32>
    %10 = arith.truncf %9 : vector<256x128xf32> to vector<256x128xbf16>
    %c0_7 = arith.constant 0 : index
    %c0_8 = arith.constant 0 : index
    %11 = vector.load %arg5[%c0_7, %c0_8] : memref<256x128xbf16, #tpu.memory_space<vmem>>, vector<256x128xbf16>
    tpu.vector_store %arg5[%c0_7, %c0_8], %10 {strides = array<i32>} : memref<256x128xbf16, #tpu.memory_space<vmem>>, vector<256x128xbf16>,
    return
  }
  func.func @transform_0(%arg0: i32, %arg1: i32) -> (i32, i32) {
    %c0_i32 = arith.constant 0 : i32
    %c0_i32_0 = arith.constant 0 : i32
    return %arg0, %c0_i32 : i32, i32
  }
  func.func @transform_1(%arg0: i32, %arg1: i32) -> (i32, i32) {
    %c0_i32 = arith.constant 0 : i32
    %c0_i32_0 = arith.constant 0 : i32
    return %c0_i32, %arg1 : i32, i32
  }
  func.func @transform_2(%arg0: i32, %arg1: i32) -> (i32, i32) {
    %c0_i32 = arith.constant 0 : i32
    %c0_i32_0 = arith.constant 0 : i32
    return %c0_i32, %arg1 : i32, i32
  }
  func.func @transform_3(%arg0: i32, %arg1: i32) -> (i32, i32) {
    %c0_i32 = arith.constant 0 : i32
    return %arg0, %arg1 : i32, i32
  }
}

</mosaic_0001>

<bundles_post_ra>
// kernel: tpu_custom_call.1
= control target key start
LH: loop header
LB: loop body
LE: loop exit
PB: predicated region body
PF: predicated region fallthrough
CT: control target
= control target key end

     0   :  { %s1930_s0 = inlined_call_operand.hbm [shape: bf16[2048,256], index: 0, kind: input, shape index: {}]   ;;  %s1931_s1 = inlined_call_operand.hbm [shape: bf16[256,128], index: 1, kind: input, shape index: {}]   ;;  %s1932_s2 = inlined_call_operand.vmem [shape: f32[1,128], index: 2, kind: input, shape index: {}]   ;;  %s1933_s3 = inlined_call_operand.hbm [shape: bf16[2048,128], index: 3, kind: output, shape index: {}]  }
   0x1   :  { %1934 = sst [smem:[#allocation11_spill]] %s1931_s1 }
   0x2   :  { %8 = vsyncpa [#allocation3], 0 }
   0x3   :  { %10 = vsyncpa [#allocation3 + $0x1], 0 }
   0x4   :  { %11 = vsyncpa [#allocation6], 0 }
   0x5   :  { %12 = vsyncpa [#allocation4], 0 }
   0x6   :  { %14 = vsyncpa [#allocation4 + $0x1], 0  ;;  %s1660_s12 = smov 0   ;;  %s1662_s13 = smov 0  }
   0x7   :  { %s1664_s14 = smov 0   ;;  %s1666_s15 = smov 0  }
   0x8   :  { %s1668_s16 = smov 0   ;;  %s1670_s17 = smov 0  }
   0x9 LB: > { %s1032_s18 = sadd.s32 4294967295, %s1631_s17   ;;  %s1033_s19 = sadd.s32 4294967294, %s1631_s17   ;;  %s1631_s17 = sphi %s1670_s17, %s20_s17   ;;  %s1627_s16 = sphi %s1668_s16, %s1947_s16   ;;  %s1623_s15 = sphi %s1666_s15, %s1946_s15   ;;  %s1619_s14 = sphi %s1664_s14, %s1945_s14   ;;  %s1615_s13 = sphi %s1662_s13, %s1944_s13   ;;  %s1611_s12 = sphi %s1660_s12, %s1943_s12  }
   0xa   : > { %p52_p0 = scmp.ne.s32.totalorder %s1615_s13, %s1611_s12  ;;  %p1694_p1 = scmp.eq.s32.totalorder %s1032_s18, 0 }
   0xb   : > { %p1698_p2 = scmp.eq.s32.totalorder %s1032_s18, 7  ;;  %p136_p3 = scmp.eq.s32.totalorder %s1033_s19, 7 }
   0xc   : > { %p1704_p4 = por %p1694_p1, %p52_p0  ;;  %p1034_p5 = scmp.ge.s32.totalorder %s1631_s17, 1 }
   0xd   : > { %p1709_p6 = por %p136_p3, %p52_p0  ;;  %p143_p7 = scmp.lt.s32.totalorder %s1631_s17, 9 }
   0xe   : > { %s1939_s1 = sld [smem:[#allocation11_spill]]  ;;  %s1633_s28 = smov [#allocation5]  }
   0xf   : > { %p1717_p8 = pnand %p1034_p5, %p143_p7  ;;  %s158_s29 = sshll.u32 %s1633_s28, 4  ;;  %s159_s29 = int_to_ptr.vmem [resolvable:$true] %s158_s29 }
  0x10   : > { %s1634_s30 = smov 64   ;;  %s1635_s4 = smov 4  }
  0x11   : > { %p1413_p9 = pneg %p1717_p8  ;;  %s32_s5 = sadd.s32 1, %s1627_s16 }
  0x12   : > { %p34_p11 = scmp.ge.s32.totalorder %s32_s5, 8  ;;  %s39_s6 = sadd.s32 1, %s1619_s14 }
  0x13   : > { %p1414_p10 = pnand %p1413_p9, %p1694_p1  ;;  %p46_p12 = scmp.ne.s32.totalorder %s1619_s14, %s1615_s13 }
  0x14   : > { %s156_s26 = sshll.u32 %s1939_s1, 4  ;;  %p47_p13 = scmp.eq.s32.totalorder %s1631_s17, 0  ;;  %s157_s26 = int_to_ptr.hbm [resolvable:$true] %s156_s26 }
  0x15   : > { %1416 = dma.hbm_to_vmem [thread:$0]  (!%p1414_p10), %s157_s26, 2048, %s159_s29, [#allocation6], %s1634_s30, %s1634_s30, %s1635_s4  }
  0x16   : > { %s1949_s5 = smov (%p34_p11, %s32_s5), 0  ;;  %p1732_p0 = por %p47_p13, %p46_p12 }
  0x17   : > { %p1738_p3 = por %p1698_p2, %p46_p12  ;;  %s36_s9 = ssub.s32 %s1627_s16, %s1949_s5 }
  0x18   : > { %p1426_p5 = scmp.lt.s32.totalorder %s1631_s17, 8  ;;  %p37_p7 = scmp.eq.s32.totalorder %s36_s9, 0 }
  0x19   : > { %s178_s10 = sand.u32 1, %s1619_s14   ;;  %s1244_s19 = sshll.u32 %s1627_s16, 8 }
  0x1a   : > { %s1038_s11 = sshll.u32 %s178_s10, 8  ;;  %s188_s26 = scalar_lea.hbm %s1930_s0, %s1244_s19 }
  0x1b   : > { %s1747_s18 = scalar_select %p37_p7, %s1619_s14, %s39_s6  }
  0x1c   : > { %s182_s28 = scalar_lea.vmem [#allocation2], %s1038_s11  ;;  %s189_s21 = sshll.u32 %s188_s26, 4  ;;  %s190_s21 = int_to_ptr.hbm [resolvable:$true] %s189_s21 }
  0x1d   : > { %s191_s29 = sshll.u32 %s182_s28, 4  ;;  %p1418_p2 = pnand %p1426_p5, %p1732_p0  ;;  %s192_s29 = int_to_ptr.vmem [resolvable:$true] %s191_s29 }
  0x1e   : > { %s179_s30 = scalar_lea.sflag [#allocation3], %s178_s10  ;;  %s1636_s4 = smov 128  }
  0x1f   : > { %s1637_s1 = smov 8   ;;  %203 = sbr.rel (%p1717_p8) target bundleno = 338 (0x152), region = 32 }
  0x20   : > { %1420 = dma.hbm_to_vmem [thread:$0]  (!%p1418_p2), %s190_s21, 4096, %s192_s29, %s179_s30, %s1636_s4, %s1636_s4, %s1637_s1  }
  0x21   : > { %s1758_s6 = sand.u32 (!%p1717_p8), 1, %s1615_s13  }
  0x22   : > { %s1043_s9 = sshll.u32 (!%p1717_p8), %s1758_s6, 8  ;;  %s206_s11 = scalar_lea.sflag (!%p1717_p8), [#allocation3], %s1758_s6 }
  0x23   : > { %s1762_s19 = scalar_lea.vmem (!%p1717_p8), [#allocation2], %s1043_s9 }
  0x24   : > { %1598 = dma.done.wait (%p1704_p4), %s206_s11, 4096  }
  0x25   : > { %1600 = vsyncadd (%p1704_p4), %s206_s11, 4294963200 }
  0x26   : > { %1602 = dma.done.wait (%p1694_p1), [#allocation6], 2048  }
  0x27   : > { %1604 = vsyncadd (%p1694_p1), [#allocation6], 4294965248  ;;  %v1284_v0 = vld [vmem:[#allocation5 + $0x38] sm:$0xff]  ;;  %v1283_v2 = vld [vmem:[#allocation5 + $0x30] sm:$0xff]  ;;  %s1045_s22 = sshll.u32 %s1758_s6, 7  ;;  %s1293_s7 = sshll.u32 %s1623_s15, 7 }
  0x28   : > { %v1292_v1 = vld [vmem:[#allocation5 + $0x78] sm:$0xff]  ;;  %566 = vmatpush.bf16.msra.mxu0 %v1284_v0  ;;  %1389 = vmatpush.bf16.msra.mxu2 %v1284_v0  ;;  %v1291_v3 = vld [vmem:[#allocation5 + $0x70] sm:$0xff]  ;;  %v1282_v4 = vld [vmem:[#allocation5 + $0x28] sm:$0xff]  ;;  %s1845_s27 = scalar_lea.vmem [#allocation7], %s1045_s22  ;;  %s921_s25 = scalar_lea.hbm %s1933_s3, %s1293_s7 }
  0x29   : > { %655 = vmatpush.bf16.msra.mxu1 %v1292_v1  ;;  %1397 = vmatpush.bf16.msra.mxu3 %v1292_v1  ;;  %v1290_v5 = vld [vmem:[#allocation5 + $0x68] sm:$0xff]  ;;  %v1281_v6 = vld [vmem:[#allocation5 + $0x20] sm:$0xff]  ;;  %v1280_v8 = vld [vmem:[#allocation5 + $0x18] sm:$0xff]  ;;  %s922_s26 = sshll.u32 %s1845_s27, 4  ;;  %s924_s15 = sshll.u32 %s921_s25, 4  ;;  %s923_s26 = int_to_ptr.vmem [resolvable:$true] %s922_s26  ;;  %s925_s15 = int_to_ptr.hbm [resolvable:$true] %s924_s15 }
  0x2a   : > { %v1289_v7 = vld [vmem:[#allocation5 + $0x60] sm:$0xff]  ;;  %v1288_v9 = vld [vmem:[#allocation5 + $0x58] sm:$0xff]  ;;  %v1279_v10 = vld [vmem:[#allocation5 + $0x10] sm:$0xff]  ;;  %s909_s28 = scalar_lea.sflag [#allocation4], %s1758_s6  ;;  %s1559_s29 = sshra.s32 %s925_s15, 4  ;;  %s1560_s29 = int_to_ptr.hbm [resolvable:$true] %s1559_s29 }
  0x2b   : > { %v1287_v11 = vld [vmem:[#allocation5 + $0x50] sm:$0xff]  ;;  %v1278_v12 = vld [vmem:[#allocation5 + $0x8] sm:$0xff]  ;;  %v1277_v14 = vld [vmem:[#allocation5] sm:$0xff]  ;;  %s1561_s21 = scalar_lea.hbm %s1560_s29, 128  ;;  %s1565_s9 = scalar_lea.hbm %s1933_s3, 1024 }
  0x2c   : > { %567 = vmatpush.bf16.msra.mxu0 %v1283_v2  ;;  %1390 = vmatpush.bf16.msra.mxu2 %v1283_v2  ;;  %v1286_v13 = vld [vmem:[#allocation5 + $0x48] sm:$0xff]  ;;  %v1285_v15 = vld [vmem:[#allocation5 + $0x40] sm:$0xff]  ;;  %v1056_v28 = vld [vmem:[%s1762_s19 + $0x10] sm:$0xf]  ;;  %p1562_p1 = scmp.ne.s32.totalorder %s1560_s29, %s1561_s21  ;;  %p1566_p9 = scmp.lt.s32.totalorder %s1560_s29, %s1933_s3 }
  0x2d   : > { %656 = vmatpush.bf16.msra.mxu1 %v1291_v3  ;;  %1398 = vmatpush.bf16.msra.mxu3 %v1291_v3  ;;  %v1048_v16 = vld [vmem:[%s1762_s19] sm:$0xf]  ;;  %v1246_v17 = vld [vmem:[%s1762_s19 + $0x4] sm:$0xf0]  ;;  %v1245_v20 = vld [vmem:[%s1762_s19 + $0x4] sm:$0xf]  ;;  %p1567_p10 = scmp.lt.s32.totalorder %s1565_s9, %s1561_s21 }
  0x2e   : > { %v1112_v18 = vld [vmem:[%s1762_s19 + $0x80] sm:$0xf]  ;;  %v1262_v19 = vld [vmem:[%s1762_s19 + $0x84] sm:$0xf0]  ;;  %v1050_v21 = vld [vmem:[%s1762_s19 + $0x8] sm:$0xf0]  ;;  %v1049_v24 = vor.u32 %v1246_v17, %v1048_v16  ;;  %p1563_p4 = pnand %p1562_p1, %p1738_p3 }
  0x2f   : > { %v1261_v22 = vld [vmem:[%s1762_s19 + $0x84] sm:$0xf]  ;;  %v1114_v23 = vld [vmem:[%s1762_s19 + $0x88] sm:$0xf0]  ;;  %v1113_v25 = vor.u32 %v1262_v19, %v1112_v18  ;;  %v1053_v26 = vor.u32 %v1245_v20, %v1050_v21  ;;  %v1248_v29 = vld [vmem:[%s1762_s19 + $0x14] sm:$0xf0]  ;;  %p1568_p11 = por %p1567_p10, %p1566_p9 }
  0x30   : > { %568 = vmatpush.bf16.msra.mxu0 %v1282_v4  ;;  %1391 = vmatpush.bf16.msra.mxu2 %v1282_v4  ;;  %v1117_v27 = vor.u32 %v1261_v22, %v1114_v23  ;;  %v1120_v30 = vld [vmem:[%s1762_s19 + $0x90] sm:$0xf]  ;;  %v1264_v31 = vld [vmem:[%s1762_s19 + $0x94] sm:$0xf0]  ;;  %v1247_v32 = vld [vmem:[%s1762_s19 + $0x14] sm:$0xf]  ;;  %v1057_v36 = vor.u32 %v1248_v29, %v1056_v28  ;;  %p1564_p8 = pneg %p1563_p4 }
  0x31   : > { %657 = vmatpush.bf16.msra.mxu1 %v1290_v5  ;;  %1399 = vmatpush.bf16.msra.mxu3 %v1290_v5  ;;  %v1058_v33 = vld [vmem:[%s1762_s19 + $0x18] sm:$0xf0]  ;;  %v1263_v34 = vld [vmem:[%s1762_s19 + $0x94] sm:$0xf]  ;;  %v1121_v37 = vor.u32 %v1264_v31, %v1120_v30  ;;  %v1064_v40 = vld [vmem:[%s1762_s19 + $0x20] sm:$0xf] }
  0x32   : > { %v1122_v35 = vld [vmem:[%s1762_s19 + $0x98] sm:$0xf0]  ;;  %v1061_v38 = vor.u32 %v1247_v32, %v1058_v33  ;;  %v1250_v41 = vld [vmem:[%s1762_s19 + $0x24] sm:$0xf0]  ;;  %v1128_v42 = vld [vmem:[%s1762_s19 + $0xa0] sm:$0xf]  ;;  %p1569_p12 = pnand %p1568_p11, %p1564_p8 }
  0x33   : > { %v1125_v39 = vor.u32 %v1263_v34, %v1122_v35  ;;  %v1266_v43 = vld [vmem:[%s1762_s19 + $0xa4] sm:$0xf0]  ;;  %v1249_v44 = vld [vmem:[%s1762_s19 + $0x24] sm:$0xf]  ;;  %v1066_v45 = vld [vmem:[%s1762_s19 + $0x28] sm:$0xf0]  ;;  %v1065_v48 = vor.u32 %v1250_v41, %v1064_v40 }
  0x34   : > { %569 = vmatpush.bf16.msra.mxu0 %v1281_v6  ;;  %1392 = vmatpush.bf16.msra.mxu2 %v1281_v6  ;;  %v1265_v46 = vld [vmem:[%s1762_s19 + $0xa4] sm:$0xf]  ;;  %v1130_v47 = vld [vmem:[%s1762_s19 + $0xa8] sm:$0xf0]  ;;  %v1129_v49 = vor.u32 %v1266_v43, %v1128_v42  ;;  %v1069_v50 = vor.u32 %v1249_v44, %v1066_v45  ;;  %v1072_v52 = vld [vmem:[%s1762_s19 + $0x30] sm:$0xf] }
  0x35   : > { %658 = vmatpush.bf16.msra.mxu1 %v1289_v7  ;;  %1400 = vmatpush.bf16.msra.mxu3 %v1289_v7  ;;  %v1133_v51 = vor.u32 %v1265_v46, %v1130_v47  ;;  %v1252_v53 = vld [vmem:[%s1762_s19 + $0x34] sm:$0xf0]  ;;  %v1136_v54 = vld [vmem:[%s1762_s19 + $0xb0] sm:$0xf]  ;;  %v1251_v56 = vld [vmem:[%s1762_s19 + $0x34] sm:$0xf] }
  0x36   : > { %v1268_v55 = vld [vmem:[%s1762_s19 + $0xb4] sm:$0xf0]  ;;  %v1074_v57 = vld [vmem:[%s1762_s19 + $0x38] sm:$0xf0]  ;;  %v1267_v58 = vld [vmem:[%s1762_s19 + $0xb4] sm:$0xf]  ;;  %v1073_v60 = vor.u32 %v1252_v53, %v1072_v52 }
  0x37   : > { %v1138_v59 = vld [vmem:[%s1762_s19 + $0xb8] sm:$0xf0]  ;;  %v1137_v61 = vor.u32 %v1268_v55, %v1136_v54  ;;  %v1077_v62 = vor.u32 %v1251_v56, %v1074_v57  ;;  %v1080_v0 = vld [vmem:[%s1762_s19 + $0x40] sm:$0xf]  ;;  %v1254_v1 = vld [vmem:[%s1762_s19 + $0x44] sm:$0xf0] }
  0x38   : > { %570 = vmatpush.bf16.msra.mxu0 %v1280_v8  ;;  %1393 = vmatpush.bf16.msra.mxu2 %v1280_v8  ;;  %v1141_v63 = vor.u32 %v1267_v58, %v1138_v59  ;;  %v1144_v2 = vld [vmem:[%s1762_s19 + $0xc0] sm:$0xf]  ;;  %v1270_v3 = vld [vmem:[%s1762_s19 + $0xc4] sm:$0xf0]  ;;  %v1253_v4 = vld [vmem:[%s1762_s19 + $0x44] sm:$0xf]  ;;  %v1081_v8 = vor.u32 %v1254_v1, %v1080_v0 }
  0x39   : > { %659 = vmatpush.bf16.msra.mxu1 %v1288_v9  ;;  %1401 = vmatpush.bf16.msra.mxu3 %v1288_v9  ;;  %v1082_v5 = vld [vmem:[%s1762_s19 + $0x48] sm:$0xf0]  ;;  %v1269_v6 = vld [vmem:[%s1762_s19 + $0xc4] sm:$0xf]  ;;  %v1145_v9 = vor.u32 %v1270_v3, %v1144_v2  ;;  %v1255_v16 = vld [vmem:[%s1762_s19 + $0x54] sm:$0xf] }
  0x3a   : > { %v1146_v7 = vld [vmem:[%s1762_s19 + $0xc8] sm:$0xf0]  ;;  %v1090_v17 = vld [vmem:[%s1762_s19 + $0x58] sm:$0xf0]  ;;  %v1271_v18 = vld [vmem:[%s1762_s19 + $0xd4] sm:$0xf] }
  0x3b   : > { %v1154_v19 = vld [vmem:[%s1762_s19 + $0xd8] sm:$0xf0]  ;;  %v1093_v22 = vor.u32 %v1255_v16, %v1090_v17  ;;  %v1257_v28 = vld [vmem:[%s1762_s19 + $0x64] sm:$0xf]  ;;  %v1098_v29 = vld [vmem:[%s1762_s19 + $0x68] sm:$0xf0] }
  0x3c   : > { %571 = vmatpush.bf16.msra.mxu0 %v1279_v10  ;;  %1394 = vmatpush.bf16.msra.mxu2 %v1279_v10  ;;  %v1085_v10 = vor.u32 %v1253_v4, %v1082_v5  ;;  %v1157_v23 = vor.u32 %v1271_v18, %v1154_v19  ;;  %v1273_v30 = vld [vmem:[%s1762_s19 + $0xe4] sm:$0xf]  ;;  %v1162_v31 = vld [vmem:[%s1762_s19 + $0xe8] sm:$0xf0]  ;;  %v1101_v34 = vor.u32 %v1257_v28, %v1098_v29  ;;  %v1259_v40 = vld [vmem:[%s1762_s19 + $0x74] sm:$0xf] }
  0x3d   : > { %660 = vmatpush.bf16.msra.mxu1 %v1287_v11  ;;  %1402 = vmatpush.bf16.msra.mxu3 %v1287_v11  ;;  %v1149_v11 = vor.u32 %v1269_v6, %v1146_v7  ;;  %v1165_v35 = vor.u32 %v1273_v30, %v1162_v31  ;;  %v1106_v41 = vld [vmem:[%s1762_s19 + $0x78] sm:$0xf0]  ;;  %v1275_v42 = vld [vmem:[%s1762_s19 + $0xf4] sm:$0xf]  ;;  %v1839_v54 = vld [vmem:[%s1932_s2] ss:$0 sm:$0xff] }
  0x3e   : > { %v1170_v43 = vld [vmem:[%s1762_s19 + $0xf8] sm:$0xf0]  ;;  %v1109_v46 = vor.u32 %v1259_v40, %v1106_v41 }
  0x3f   : > { %v1173_v47 = vor.u32 %v1275_v42, %v1170_v43 }
  0x40   : > { %572 = vmatpush.bf16.msra.mxu0 %v1278_v12  ;;  %1395 = vmatpush.bf16.msra.mxu2 %v1278_v12  ;;  %v1088_v12 = vld [vmem:[%s1762_s19 + $0x50] sm:$0xf] }
  0x41   : > { %661 = vmatpush.bf16.msra.mxu1 %v1286_v13  ;;  %1403 = vmatpush.bf16.msra.mxu3 %v1286_v13  ;;  %v1256_v13 = vld [vmem:[%s1762_s19 + $0x54] sm:$0xf0] }
  0x42   : > { %v1089_v20 = vor.u32 %v1256_v13, %v1088_v12 }
  0x44   : > { %573 = vmatpush.bf16.msra.mxu0 %v1277_v14  ;;  %1396 = vmatpush.bf16.msra.mxu2 %v1277_v14  ;;  %v1152_v14 = vld [vmem:[%s1762_s19 + $0xd0] sm:$0xf] }
  0x45   : > { %662 = vmatpush.bf16.msra.mxu1 %v1285_v15  ;;  %1404 = vmatpush.bf16.msra.mxu3 %v1285_v15  ;;  %v1272_v15 = vld [vmem:[%s1762_s19 + $0xd4] sm:$0xf0] }
  0x46   : > { %v1153_v21 = vor.u32 %v1272_v15, %v1152_v14 }
  0x47   : > { %574 = vmatmul.bf16.vlgmr.msra.gmra.mxu0 %v1049_v24  ;;  %614 = vmatmul.bf16.vlgmr.msra.gmra.mxu2 %v1113_v25  ;;  %v1096_v24 = vld [vmem:[%s1762_s19 + $0x60] sm:$0xf]  ;;  %v1258_v25 = vld [vmem:[%s1762_s19 + $0x64] sm:$0xf0] }
  0x48   : > { %663 = vmatmul.bf16.vlgmr.msra.gmra.mxu1 %v1053_v26  ;;  %703 = vmatmul.bf16.vlgmr.msra.gmra.mxu3 %v1117_v27  ;;  %v1160_v26 = vld [vmem:[%s1762_s19 + $0xe0] sm:$0xf]  ;;  %v1274_v27 = vld [vmem:[%s1762_s19 + $0xe4] sm:$0xf0]  ;;  %v1097_v32 = vor.u32 %v1258_v25, %v1096_v24 }
  0x49   : > { %v1161_v33 = vor.u32 %v1274_v27, %v1160_v26 }
  0x57   : > { %579 = vmatmul.bf16.gmra.mxu0 %v1057_v36  ;;  %619 = vmatmul.bf16.gmra.mxu2 %v1121_v37  ;;  %v1104_v36 = vld [vmem:[%s1762_s19 + $0x70] sm:$0xf]  ;;  %v1260_v37 = vld [vmem:[%s1762_s19 + $0x74] sm:$0xf0] }
  0x58   : > { %668 = vmatmul.bf16.gmra.mxu1 %v1061_v38  ;;  %708 = vmatmul.bf16.gmra.mxu3 %v1125_v39  ;;  %v1168_v38 = vld [vmem:[%s1762_s19 + $0xf0] sm:$0xf]  ;;  %v1276_v39 = vld [vmem:[%s1762_s19 + $0xf4] sm:$0xf0]  ;;  %v1105_v44 = vor.u32 %v1260_v37, %v1104_v36 }
  0x59   : > { %v1169_v45 = vor.u32 %v1276_v39, %v1168_v38 }
  0x67   : > { %584 = vmatmul.bf16.gmra.mxu0 %v1065_v48  ;;  %624 = vmatmul.bf16.gmra.mxu2 %v1129_v49 }
  0x68   : > { %673 = vmatmul.bf16.gmra.mxu1 %v1069_v50  ;;  %713 = vmatmul.bf16.gmra.mxu3 %v1133_v51 }
  0x77   : > { %589 = vmatmul.bf16.gmra.mxu0 %v1073_v60  ;;  %629 = vmatmul.bf16.gmra.mxu2 %v1137_v61 }
  0x78   : > { %678 = vmatmul.bf16.gmra.mxu1 %v1077_v62  ;;  %718 = vmatmul.bf16.gmra.mxu3 %v1141_v63 }
  0x87   : > { %594 = vmatmul.bf16.gmra.mxu0 %v1081_v8  ;;  %634 = vmatmul.bf16.gmra.mxu2 %v1145_v9 }
  0x88   : > { %683 = vmatmul.bf16.gmra.mxu1 %v1085_v10  ;;  %723 = vmatmul.bf16.gmra.mxu3 %v1149_v11 }
  0x97   : > { %599 = vmatmul.bf16.gmra.mxu0 %v1089_v20  ;;  %639 = vmatmul.bf16.gmra.mxu2 %v1153_v21 }
  0x98   : > { %688 = vmatmul.bf16.gmra.mxu1 %v1093_v22  ;;  %728 = vmatmul.bf16.gmra.mxu3 %v1157_v23 }
  0xa7   : > { %604 = vmatmul.bf16.gmra.mxu0 %v1097_v32  ;;  %644 = vmatmul.bf16.gmra.mxu2 %v1161_v33 }
  0xa8   : > { %693 = vmatmul.bf16.gmra.mxu1 %v1101_v34  ;;  %733 = vmatmul.bf16.gmra.mxu3 %v1165_v35 }
  0xb7   : > { %609 = vmatmul.bf16.gmra.mxu0 %v1105_v44  ;;  %649 = vmatmul.bf16.gmra.mxu2 %v1169_v45 }
  0xb8   : > { %698 = vmatmul.bf16.gmra.mxu1 %v1109_v46  ;;  %738 = vmatmul.bf16.gmra.mxu3 %v1173_v47 }
  0xc4   : > { %v575_v48 = vpop.f32.mrf.mxu0 }
  0xc5   : > { %v664_v49 = vpop.f32.mrf.mxu1 }
  0xc6   : > { %v665_v50 = vadd.f32 %v664_v49, %v575_v48 }
  0xc8   : > { %v745_v53 = vmul.f32 0.999995, %v665_v50 }
  0xca   : > { %v615_v51 = vpop.f32.mrf.mxu2  ;;  %v780_v59 = vadd.f32 %v1839_v54, %v745_v53 }
  0xcb   : > { %v704_v52 = vpop.f32.mrf.mxu3 }
  0xcc   : > { %v577_v55 = vpop.f32.mrf.mxu0  ;;  %v705_v57 = vadd.f32 %v704_v52, %v615_v51  ;;  %v812_v1 = vmax.f32 %v780_v59, 0.0 }
  0xcd   : > { %v666_v56 = vpop.f32.mrf.mxu1 }
  0xce   : > { %v667_v58 = vadd.f32 %v666_v56, %v577_v55  ;;  %v761_v61 = vmul.f32 0.999995, %v705_v57 }
  0xd0   : > { %v746_v60 = vmul.f32 0.999995, %v667_v58  ;;  %v796_v6 = vadd.f32 %v1839_v54, %v761_v61 }
  0xd2   : > { %v781_v62 = vadd.f32 %v1839_v54, %v746_v60  ;;  %v617_v63 = vpop.f32.mrf.mxu2  ;;  %v828_v11 = vmax.f32 %v796_v6, 0.0 }
  0xd3   : > { %v706_v0 = vpop.f32.mrf.mxu3 }
  0xd4   : > { %v813_v2 = vmax.f32 %v781_v62, 0.0  ;;  %v707_v3 = vadd.f32 %v706_v0, %v617_v63  ;;  %v580_v4 = vpop.f32.mrf.mxu0 }
  0xd5   : > { %v669_v5 = vpop.f32.mrf.mxu1 }
  0xd6   : > { %v1297_v7 = vpack.c.bf16 %v813_v2, %v812_v1  ;;  %v762_v8 = vmul.f32 0.999995, %v707_v3  ;;  %v670_v10 = vadd.f32 %v669_v5, %v580_v4 }
  0xd8   : > { %1298 = vst [vmem:[%s1845_s27] sm:$0xff] %v1297_v7   ;;  %v797_v9 = vadd.f32 %v1839_v54, %v762_v8  ;;  %v747_v16 = vmul.f32 0.999995, %v670_v10 }
  0xda   : > { %v829_v12 = vmax.f32 %v797_v9, 0.0  ;;  %v620_v13 = vpop.f32.mrf.mxu2  ;;  %v782_v21 = vadd.f32 %v1839_v54, %v747_v16 }
  0xdb   : > { %v709_v14 = vpop.f32.mrf.mxu3 }
  0xdc   : > { %v1337_v15 = vpack.c.bf16 %v829_v12, %v828_v11  ;;  %v582_v17 = vpop.f32.mrf.mxu0  ;;  %v710_v19 = vadd.f32 %v709_v14, %v620_v13  ;;  %v814_v27 = vmax.f32 %v782_v21, 0.0 }
  0xdd   : > { %v671_v18 = vpop.f32.mrf.mxu1 }
  0xde   : > { %1381 = vst [vmem:[%s1845_s27 + $0x40] sm:$0xff] %v1337_v15   ;;  %v672_v20 = vadd.f32 %v671_v18, %v582_v17  ;;  %v763_v23 = vmul.f32 0.999995, %v710_v19 }
  0xe0   : > { %v748_v22 = vmul.f32 0.999995, %v672_v20  ;;  %v798_v32 = vadd.f32 %v1839_v54, %v763_v23 }
  0xe2   : > { %v783_v24 = vadd.f32 %v1839_v54, %v748_v22  ;;  %v622_v25 = vpop.f32.mrf.mxu2  ;;  %v830_v37 = vmax.f32 %v798_v32, 0.0 }
  0xe3   : > { %v711_v26 = vpop.f32.mrf.mxu3 }
  0xe4   : > { %v815_v28 = vmax.f32 %v783_v24, 0.0  ;;  %v712_v29 = vadd.f32 %v711_v26, %v622_v25  ;;  %v585_v30 = vpop.f32.mrf.mxu0 }
  0xe5   : > { %v674_v31 = vpop.f32.mrf.mxu1 }
  0xe6   : > { %v1302_v33 = vpack.c.bf16 %v815_v28, %v814_v27  ;;  %v764_v34 = vmul.f32 0.999995, %v712_v29  ;;  %v675_v36 = vadd.f32 %v674_v31, %v585_v30 }
  0xe8   : > { %1374 = vst [vmem:[%s1845_s27 + $0x8] sm:$0xff] %v1302_v33   ;;  %v799_v35 = vadd.f32 %v1839_v54, %v764_v34  ;;  %v749_v42 = vmul.f32 0.999995, %v675_v36 }
  0xea   : > { %v831_v38 = vmax.f32 %v799_v35, 0.0  ;;  %v625_v39 = vpop.f32.mrf.mxu2  ;;  %v784_v47 = vadd.f32 %v1839_v54, %v749_v42 }
  0xeb   : > { %v714_v40 = vpop.f32.mrf.mxu3 }
  0xec   : > { %v1342_v41 = vpack.c.bf16 %v831_v38, %v830_v37  ;;  %v587_v43 = vpop.f32.mrf.mxu0  ;;  %v715_v45 = vadd.f32 %v714_v40, %v625_v39  ;;  %v816_v53 = vmax.f32 %v784_v47, 0.0 }
  0xed   : > { %v676_v44 = vpop.f32.mrf.mxu1 }
  0xee   : > { %1382 = vst [vmem:[%s1845_s27 + $0x48] sm:$0xff] %v1342_v41   ;;  %v677_v46 = vadd.f32 %v676_v44, %v587_v43  ;;  %v765_v49 = vmul.f32 0.999995, %v715_v45 }
  0xf0   : > { %v750_v48 = vmul.f32 0.999995, %v677_v46  ;;  %v800_v59 = vadd.f32 %v1839_v54, %v765_v49 }
  0xf2   : > { %v785_v50 = vadd.f32 %v1839_v54, %v750_v48  ;;  %v627_v51 = vpop.f32.mrf.mxu2  ;;  %v832_v0 = vmax.f32 %v800_v59, 0.0 }
  0xf3   : > { %v716_v52 = vpop.f32.mrf.mxu3 }
  0xf4   : > { %v817_v55 = vmax.f32 %v785_v50, 0.0  ;;  %v717_v56 = vadd.f32 %v716_v52, %v627_v51  ;;  %v590_v57 = vpop.f32.mrf.mxu0 }
  0xf5   : > { %v679_v58 = vpop.f32.mrf.mxu1 }
  0xf6   : > { %v1307_v60 = vpack.c.bf16 %v817_v55, %v816_v53  ;;  %v766_v61 = vmul.f32 0.999995, %v717_v56  ;;  %v680_v63 = vadd.f32 %v679_v58, %v590_v57 }
  0xf8   : > { %1375 = vst [vmem:[%s1845_s27 + $0x10] sm:$0xff] %v1307_v60   ;;  %v801_v62 = vadd.f32 %v1839_v54, %v766_v61  ;;  %v751_v5 = vmul.f32 0.999995, %v680_v63 }
  0xfa   : > { %v833_v1 = vmax.f32 %v801_v62, 0.0  ;;  %v630_v2 = vpop.f32.mrf.mxu2  ;;  %v786_v10 = vadd.f32 %v1839_v54, %v751_v5 }
  0xfb   : > { %v719_v3 = vpop.f32.mrf.mxu3 }
  0xfc   : > { %v1347_v4 = vpack.c.bf16 %v833_v1, %v832_v0  ;;  %v592_v6 = vpop.f32.mrf.mxu0  ;;  %v720_v8 = vadd.f32 %v719_v3, %v630_v2  ;;  %v818_v16 = vmax.f32 %v786_v10, 0.0 }
  0xfd   : > { %v681_v7 = vpop.f32.mrf.mxu1 }
  0xfe   : > { %1383 = vst [vmem:[%s1845_s27 + $0x50] sm:$0xff] %v1347_v4   ;;  %v682_v9 = vadd.f32 %v681_v7, %v592_v6  ;;  %v767_v12 = vmul.f32 0.999995, %v720_v8 }
 0x100   : > { %v752_v11 = vmul.f32 0.999995, %v682_v9  ;;  %v802_v21 = vadd.f32 %v1839_v54, %v767_v12 }
 0x102   : > { %v787_v13 = vadd.f32 %v1839_v54, %v752_v11  ;;  %v632_v14 = vpop.f32.mrf.mxu2  ;;  %v834_v26 = vmax.f32 %v802_v21, 0.0 }
 0x103   : > { %v721_v15 = vpop.f32.mrf.mxu3 }
 0x104   : > { %v819_v17 = vmax.f32 %v787_v13, 0.0  ;;  %v722_v18 = vadd.f32 %v721_v15, %v632_v14  ;;  %v595_v19 = vpop.f32.mrf.mxu0 }
 0x105   : > { %v684_v20 = vpop.f32.mrf.mxu1 }
 0x106   : > { %v1312_v22 = vpack.c.bf16 %v819_v17, %v818_v16  ;;  %v768_v23 = vmul.f32 0.999995, %v722_v18  ;;  %v685_v25 = vadd.f32 %v684_v20, %v595_v19 }
 0x108   : > { %1376 = vst [vmem:[%s1845_s27 + $0x18] sm:$0xff] %v1312_v22   ;;  %v803_v24 = vadd.f32 %v1839_v54, %v768_v23  ;;  %v753_v31 = vmul.f32 0.999995, %v685_v25 }
 0x10a   : > { %v835_v27 = vmax.f32 %v803_v24, 0.0  ;;  %v635_v28 = vpop.f32.mrf.mxu2  ;;  %v788_v36 = vadd.f32 %v1839_v54, %v753_v31 }
 0x10b   : > { %v724_v29 = vpop.f32.mrf.mxu3 }
 0x10c   : > { %v1352_v30 = vpack.c.bf16 %v835_v27, %v834_v26  ;;  %v597_v32 = vpop.f32.mrf.mxu0  ;;  %v725_v34 = vadd.f32 %v724_v29, %v635_v28  ;;  %v820_v42 = vmax.f32 %v788_v36, 0.0 }
 0x10d   : > { %v686_v33 = vpop.f32.mrf.mxu1 }
 0x10e   : > { %1384 = vst [vmem:[%s1845_s27 + $0x58] sm:$0xff] %v1352_v30   ;;  %v687_v35 = vadd.f32 %v686_v33, %v597_v32  ;;  %v769_v38 = vmul.f32 0.999995, %v725_v34 }
 0x110   : > { %v754_v37 = vmul.f32 0.999995, %v687_v35  ;;  %v804_v47 = vadd.f32 %v1839_v54, %v769_v38 }
 0x112   : > { %v789_v39 = vadd.f32 %v1839_v54, %v754_v37  ;;  %v637_v40 = vpop.f32.mrf.mxu2  ;;  %v836_v52 = vmax.f32 %v804_v47, 0.0 }
 0x113   : > { %v726_v41 = vpop.f32.mrf.mxu3 }
 0x114   : > { %v821_v43 = vmax.f32 %v789_v39, 0.0  ;;  %v727_v44 = vadd.f32 %v726_v41, %v637_v40  ;;  %v600_v45 = vpop.f32.mrf.mxu0 }
 0x115   : > { %v689_v46 = vpop.f32.mrf.mxu1 }
 0x116   : > { %v1317_v48 = vpack.c.bf16 %v821_v43, %v820_v42  ;;  %v770_v49 = vmul.f32 0.999995, %v727_v44  ;;  %v690_v51 = vadd.f32 %v689_v46, %v600_v45 }
 0x118   : > { %1377 = vst [vmem:[%s1845_s27 + $0x20] sm:$0xff] %v1317_v48   ;;  %v805_v50 = vadd.f32 %v1839_v54, %v770_v49  ;;  %v755_v58 = vmul.f32 0.999995, %v690_v51 }
 0x11a   : > { %v837_v53 = vmax.f32 %v805_v50, 0.0  ;;  %v640_v55 = vpop.f32.mrf.mxu2  ;;  %v790_v63 = vadd.f32 %v1839_v54, %v755_v58 }
 0x11b   : > { %v729_v56 = vpop.f32.mrf.mxu3 }
 0x11c   : > { %v1357_v57 = vpack.c.bf16 %v837_v53, %v836_v52  ;;  %v602_v59 = vpop.f32.mrf.mxu0  ;;  %v730_v61 = vadd.f32 %v729_v56, %v640_v55  ;;  %v822_v5 = vmax.f32 %v790_v63, 0.0 }
 0x11d   : > { %v691_v60 = vpop.f32.mrf.mxu1 }
 0x11e   : > { %1385 = vst [vmem:[%s1845_s27 + $0x60] sm:$0xff] %v1357_v57   ;;  %v692_v62 = vadd.f32 %v691_v60, %v602_v59  ;;  %v771_v1 = vmul.f32 0.999995, %v730_v61 }
 0x120   : > { %v756_v0 = vmul.f32 0.999995, %v692_v62  ;;  %v806_v10 = vadd.f32 %v1839_v54, %v771_v1 }
 0x122   : > { %v791_v2 = vadd.f32 %v1839_v54, %v756_v0  ;;  %v642_v3 = vpop.f32.mrf.mxu2  ;;  %v838_v15 = vmax.f32 %v806_v10, 0.0 }
 0x123   : > { %v731_v4 = vpop.f32.mrf.mxu3 }
 0x124   : > { %v823_v6 = vmax.f32 %v791_v2, 0.0  ;;  %v732_v7 = vadd.f32 %v731_v4, %v642_v3  ;;  %v605_v8 = vpop.f32.mrf.mxu0 }
 0x125   : > { %v694_v9 = vpop.f32.mrf.mxu1 }
 0x126   : > { %v1322_v11 = vpack.c.bf16 %v823_v6, %v822_v5  ;;  %v772_v12 = vmul.f32 0.999995, %v732_v7  ;;  %v695_v14 = vadd.f32 %v694_v9, %v605_v8 }
 0x128   : > { %1378 = vst [vmem:[%s1845_s27 + $0x28] sm:$0xff] %v1322_v11   ;;  %v807_v13 = vadd.f32 %v1839_v54, %v772_v12  ;;  %v757_v20 = vmul.f32 0.999995, %v695_v14 }
 0x12a   : > { %v839_v16 = vmax.f32 %v807_v13, 0.0  ;;  %v645_v17 = vpop.f32.mrf.mxu2  ;;  %v792_v25 = vadd.f32 %v1839_v54, %v757_v20 }
 0x12b   : > { %v734_v18 = vpop.f32.mrf.mxu3 }
 0x12c   : > { %v1362_v19 = vpack.c.bf16 %v839_v16, %v838_v15  ;;  %v607_v21 = vpop.f32.mrf.mxu0  ;;  %v735_v23 = vadd.f32 %v734_v18, %v645_v17  ;;  %v824_v31 = vmax.f32 %v792_v25, 0.0 }
 0x12d   : > { %v696_v22 = vpop.f32.mrf.mxu1 }
 0x12e   : > { %1386 = vst [vmem:[%s1845_s27 + $0x68] sm:$0xff] %v1362_v19   ;;  %v697_v24 = vadd.f32 %v696_v22, %v607_v21  ;;  %v773_v27 = vmul.f32 0.999995, %v735_v23 }
 0x130   : > { %v758_v26 = vmul.f32 0.999995, %v697_v24  ;;  %v808_v36 = vadd.f32 %v1839_v54, %v773_v27 }
 0x132   : > { %v793_v28 = vadd.f32 %v1839_v54, %v758_v26  ;;  %v647_v29 = vpop.f32.mrf.mxu2  ;;  %v840_v41 = vmax.f32 %v808_v36, 0.0 }
 0x133   : > { %v736_v30 = vpop.f32.mrf.mxu3 }
 0x134   : > { %v825_v32 = vmax.f32 %v793_v28, 0.0  ;;  %v737_v33 = vadd.f32 %v736_v30, %v647_v29  ;;  %v610_v34 = vpop.f32.mrf.mxu0 }
 0x135   : > { %v699_v35 = vpop.f32.mrf.mxu1 }
 0x136   : > { %v1327_v37 = vpack.c.bf16 %v825_v32, %v824_v31  ;;  %v774_v38 = vmul.f32 0.999995, %v737_v33  ;;  %v700_v40 = vadd.f32 %v699_v35, %v610_v34 }
 0x138   : > { %1379 = vst [vmem:[%s1845_s27 + $0x30] sm:$0xff] %v1327_v37   ;;  %v809_v39 = vadd.f32 %v1839_v54, %v774_v38  ;;  %v759_v46 = vmul.f32 0.999995, %v700_v40 }
 0x13a   : > { %v841_v42 = vmax.f32 %v809_v39, 0.0  ;;  %v650_v43 = vpop.f32.mrf.mxu2  ;;  %v794_v51 = vadd.f32 %v1839_v54, %v759_v46 }
 0x13b   : > { %v739_v44 = vpop.f32.mrf.mxu3 }
 0x13c   : > { %v1367_v45 = vpack.c.bf16 %v841_v42, %v840_v41  ;;  %v612_v47 = vpop.f32.mrf.mxu0  ;;  %v740_v49 = vadd.f32 %v739_v44, %v650_v43  ;;  %v826_v58 = vmax.f32 %v794_v51, 0.0 }
 0x13d   : > { %v701_v48 = vpop.f32.mrf.mxu1 }
 0x13e   : > { %1387 = vst [vmem:[%s1845_s27 + $0x70] sm:$0xff] %v1367_v45   ;;  %v702_v50 = vadd.f32 %v701_v48, %v612_v47  ;;  %v775_v53 = vmul.f32 0.999995, %v740_v49 }
 0x140   : > { %v760_v52 = vmul.f32 0.999995, %v702_v50  ;;  %v810_v61 = vadd.f32 %v1839_v54, %v775_v53 }
 0x142   : > { %v795_v55 = vadd.f32 %v1839_v54, %v760_v52  ;;  %v652_v56 = vpop.f32.mrf.mxu2  ;;  %v842_v1 = vmax.f32 %v810_v61, 0.0 }
 0x143   : > { %v741_v57 = vpop.f32.mrf.mxu3 }
 0x144   : > { %v827_v59 = vmax.f32 %v795_v55, 0.0  ;;  %v742_v60 = vadd.f32 %v741_v57, %v652_v56 }
 0x146   : > { %v1332_v62 = vpack.c.bf16 %v827_v59, %v826_v58  ;;  %v776_v63 = vmul.f32 0.999995, %v742_v60 }
 0x148   : > { %1380 = vst [vmem:[%s1845_s27 + $0x38] sm:$0xff] %v1332_v62   ;;  %v811_v0 = vadd.f32 %v1839_v54, %v776_v63 }
 0x14a   : > { %v843_v2 = vmax.f32 %v811_v0, 0.0 }
 0x14c   : > { %v1372_v3 = vpack.c.bf16 %v843_v2, %v842_v1 }
 0x14e   : > { %1388 = vst [vmem:[%s1845_s27 + $0x78] sm:$0xff] %v1372_v3  }
 0x14f   : > { %1572 = shalt.err (!%p1569_p12)
}
 0x150   : > { %s1638_s6 = smov 64   ;;  %s1639_s1 = smov 4  }
 0x151   : > { %1411 = dma.vmem_to_hbm [thread:$0]  (%p1738_p3), %s923_s26, 2048, %s925_s15, %s909_s28, %s1638_s6, %s1638_s6, %s1639_s1  }
 0x152 PF: > { %p1428_p13 = scmp.ge.s32.totalorder %s1631_s17, 2  ;;  %s939_s20 = sand.u32 1, %s1611_s12  }
 0x153   : > { %s940_s22 = scalar_lea.sflag [#allocation4], %s939_s20 }
 0x154   : > { %p1422_p0 = pnand %p1428_p13, %p1709_p6 }
 0x156   : > { %p1423_p5 = pneg %p1422_p0 }
 0x158   : > { %1606 = dma.done.wait (%p1423_p5), %s940_s22, 2048  }
 0x159   : > { %1608 = vsyncadd (%p1423_p5), %s940_s22, 4294965248  ;;  %s20_s17 = sadd.s32 1, %s1631_s17   ;;  %s1943_s12 = smov %s1615_s13 }
 0x15a   : > { %p17_p7 = scmp.ge.s32.totalorder %s20_s17, 10   ;;  %s1944_s13 = smov %s1619_s14 }
 0x15b   : > { %s1945_s14 = smov %s1747_s18  ;;  %s1946_s15 = smov %s1627_s16 }
 0x15c   : > { %s1947_s16 = smov %s1949_s5  ;;  %19 = sbr.rel (!%p17_p7) target bundleno = 9 (0x9), region = 85 }
 0x161   :  { %946 = vsyncpa [#allocation3], 1 }
 0x162   :  { %948 = vsyncpa [#allocation3 + $0x1], 1 }
 0x163   :  { %949 = vsyncpa [#allocation6], 1 }
 0x164   :  { %950 = vsyncpa [#allocation4], 1 }
 0x165   :  { %952 = vsyncpa [#allocation4 + $0x1], 1 }

</bundles_post_ra>
